<compile_context>
chip_gen: v7x
topology: tpu7x:2x2x1
jax: 0.10.0
libtpu: 0.0.40
codegen_flags: <defaults>
</compile_context>

<pallas_src>
import functools
import math

import jax
import jax.numpy as jnp
from jax import lax
from jax.experimental import pallas as pl
from jax.experimental.pallas import tpu as pltpu


def _self_output_kernel(x_ref, res_ref, w_ref, p_ref, o_ref, *, eps, compute_dtype):
    # x_ref:   (tm, H) storage dtype     res_ref: (tm, H) storage dtype
    # w_ref:   (H, H)  compute dtype     p_ref:   (3, H)  f32 = [bias; gamma; beta]
    # o_ref:   (tm, H) out dtype
    x = x_ref[...].astype(compute_dtype)          # cast in-kernel (no extra HBM pass)
    y = jnp.dot(x, w_ref[...], preferred_element_type=jnp.float32)
    y = y + p_ref[0:1, :] + res_ref[...].astype(jnp.float32)
    # TODO(synk): dropout is the identity at inference (eval mode); no RNG dropout here.

    # One-pass LayerNorm statistics: var = E[y^2] - mean^2 (per-row, f32).
    mean = jnp.mean(y, axis=-1, keepdims=True)
    mean_sq = jnp.mean(y * y, axis=-1, keepdims=True)
    var = jnp.maximum(mean_sq - mean * mean, 0.0)
    inv = lax.rsqrt(var + eps)
    o_ref[...] = ((y - mean) * inv * p_ref[1:2, :] + p_ref[2:3, :]).astype(o_ref.dtype)


def _round_up(a, b):
    return (a + b - 1) // b * b


def _pick_tm(M, H, x_b, r_b, w_b, o_b, tm_max):
    """Pick a row tile: as big as tm_max, but fitting a conservative VMEM budget
    (safe on v7x's 64 MiB / v5e's 16 MiB scoped default) and keeping >= 4 grid
    steps on large M so both v7x TensorCores get work."""
    def fit(t):
        # If the tile covers all rows, the block equals the full dim (always legal);
        # otherwise keep it a multiple of 8 (sublane alignment).
        return M if t >= M else max(8, (t // 8) * 8)

    tm = fit(tm_max)
    budget = 28 << 20                                   # double-buffered streams + weight
    weight_vmem = 2 * H * H * w_b                       # constant block still double-buffered
    per_row = 2 * H * (x_b + r_b + o_b) + 2 * H * 4     # streams (2x buffered) + f32 temps
    while tm > 64 and weight_vmem + tm * per_row > budget:
        tm = fit(tm // 2)
    while tm > 256 and pl.cdiv(M, tm) < 4:              # keep both v7x TCs busy
        tm = fit(tm // 2)
    return tm


def roberta_self_output(hidden_states, input_tensor, weight, bias, gamma, beta,
                        *, eps=1e-5, tm=512,
                        compute_dtype=jnp.bfloat16, out_dtype=None):
    """hidden_states/input_tensor: (B, S, H); weight: (H, H) = torch_weight.T;
    bias/gamma/beta: (H,).  Returns LayerNorm(hidden_states @ weight + bias + input_tensor)."""
    B, S, H = hidden_states.shape
    M = B * S
    out_dtype = hidden_states.dtype if out_dtype is None else out_dtype

    # Pure reshapes / tiny casts only — no extra full HBM passes over the (M, H) activations.
    x2d = hidden_states.reshape(M, H)                 # storage dtype (cast in-kernel)
    r2d = input_tensor.reshape(M, H)                  # storage dtype (upcast in-kernel)
    w = weight.astype(compute_dtype)                  # (H, H) one-time cast
    params = jnp.stack([bias, gamma, beta]).astype(jnp.float32)  # (3, H)

    x_b = jnp.dtype(x2d.dtype).itemsize
    r_b = jnp.dtype(r2d.dtype).itemsize
    w_b = jnp.dtype(compute_dtype).itemsize
    o_b = jnp.dtype(out_dtype).itemsize

    tm_eff = _pick_tm(M, H, x_b, r_b, w_b, o_b, tm_max=tm)
    grid_m = pl.cdiv(M, tm_eff)

    cost = pl.CostEstimate(
        flops=2 * M * H * H,
        transcendentals=0,
        bytes_accessed=(M * H * (x_b + r_b + o_b)     # x + residual + output
                        + H * H * w_b                 # weight (fetched once)
                        + 3 * H * 4),                 # bias/gamma/beta
    )

    vmem_needed = (2 * tm_eff * H * (x_b + r_b + o_b)   # double-buffered row streams
                   + 2 * H * H * w_b                    # double-buffered weight
                   + 2 * tm_eff * H * 4                 # f32 epilogue temps headroom
                   + 3 * H * 4)
    vmem_limit = int(min(max(vmem_needed + (8 << 20), 32 << 20), 48 << 20))

    out2d = pl.pallas_call(
        functools.partial(_self_output_kernel, eps=float(eps), compute_dtype=compute_dtype),
        out_shape=jax.ShapeDtypeStruct((M, H), out_dtype),
        grid_spec=pltpu.PrefetchScalarGridSpec(
            num_scalar_prefetch=0,
            grid=(grid_m,),
            in_specs=[
                pl.BlockSpec((tm_eff, H), lambda i: (i, 0)),  # x row tile
                pl.BlockSpec((tm_eff, H), lambda i: (i, 0)),  # residual row tile
                pl.BlockSpec((H, H), lambda i: (0, 0)),       # full weight (constant block)
                pl.BlockSpec((3, H), lambda i: (0, 0)),       # [bias; gamma; beta]
            ],
            out_specs=pl.BlockSpec((tm_eff, H), lambda i: (i, 0)),
        ),
        compiler_params=pltpu.CompilerParams(
            dimension_semantics=("parallel",),
            vmem_limit_bytes=vmem_limit,
        ),
        cost_estimate=cost,
    )(x2d, r2d, w, params)

    return out2d.reshape(B, S, H)


def _reference(hidden_states, input_tensor, weight, bias, gamma, beta, eps):
    y = jnp.einsum("bsh,hk->bsk", hidden_states, weight) + bias
    z = y + input_tensor
    mean = jnp.mean(z, axis=-1, keepdims=True)
    var = jnp.mean((z - mean) ** 2, axis=-1, keepdims=True)
    return (z - mean) * lax.rsqrt(var + eps) * gamma + beta


def _make_inputs(key, B, S, H):
    kx, kr, kw, kb, kg, kbeta = jax.random.split(key, 6)
    hidden_states = jax.random.normal(kx, (B, S, H), dtype=jnp.float32)
    input_tensor = jax.random.normal(kr, (B, S, H), dtype=jnp.float32)
    # nn.Linear(H, H): torch weight is (out, in) = (H, H); the kernel consumes its transpose.
    w_torch = jax.random.normal(kw, (H, H), dtype=jnp.float32) * (1.0 / math.sqrt(H))
    bias = jax.random.normal(kb, (H,), dtype=jnp.float32) * 0.02
    gamma = 1.0 + 0.1 * jax.random.normal(kg, (H,), dtype=jnp.float32)
    beta = 0.1 * jax.random.normal(kbeta, (H,), dtype=jnp.float32)
    return hidden_states, input_tensor, w_torch.T, bias, gamma, beta


if __name__ == "__main__":
    eps = 1e-5
    key = jax.random.PRNGKey(0)
    k1, k2 = jax.random.split(key, 2)

    # Small, lane-dense shape consistent with RobertaSelfOutput: hidden_size=128, batch=2, seq=8.
    B, S, H = 2, 8, 128
    hs, res, w, b, g, bt = _make_inputs(k1, B, S, H)
    ref = _reference(hs, res, w, b, g, bt, eps)

    # Default bf16 matmul path (f32 accumulation / epilogue).
    out_bf16 = jax.block_until_ready(
        roberta_self_output(hs, res, w, b, g, bt, eps=eps))
    assert out_bf16.shape == (B, S, H)
    assert jnp.allclose(out_bf16, ref, atol=5e-2, rtol=5e-2), "bf16-path mismatch vs reference"

    # Exact f32 matmul path.
    out_f32 = jax.block_until_ready(
        roberta_self_output(hs, res, w, b, g, bt, eps=eps, compute_dtype=jnp.float32))
    assert jnp.allclose(out_f32, ref, atol=1e-4, rtol=1e-4), "f32-path mismatch vs reference"

    # Ragged row count (M = 18, not a multiple of the tile) exercises the no-pad path.
    B2, S2 = 2, 9
    hs2, res2, w2, b2, g2, bt2 = _make_inputs(k2, B2, S2, H)
    ref2 = _reference(hs2, res2, w2, b2, g2, bt2, eps)
    out2 = jax.block_until_ready(
        roberta_self_output(hs2, res2, w2, b2, g2, bt2, eps=eps, compute_dtype=jnp.float32))
    assert out2.shape == (B2, S2, H)
    assert jnp.allclose(out2, ref2, atol=1e-4, rtol=1e-4), "ragged-row mismatch vs reference"

    print("KERNEL_OK")
</pallas_src>

<mosaic_0001>
module attributes {stable_mosaic.version = 11 : i64} {
  func.func @_self_output_kernel(%arg0: i32, %arg1: memref<16x128xf32, #tpu.memory_space<vmem>>, %arg2: memref<16x128xf32, #tpu.memory_space<vmem>>, %arg3: memref<128x128xbf16, #tpu.memory_space<vmem>>, %arg4: memref<3x128xf32, #tpu.memory_space<vmem>>, %arg5: memref<16x128xf32, #tpu.memory_space<vmem>>) attributes {dimension_semantics = [#tpu.dimension_semantics<parallel>], iteration_bounds = array<i64: 1>, scalar_prefetch = 0 : i64, scratch_operands = 0 : i64, tpu.core_type = #tpu.core_type<tc>, window_params = [{transform_indices = @transform_0, window_bounds = array<i64: 16, 128>}, {transform_indices = @transform_1, window_bounds = array<i64: 16, 128>}, {pipeline_mode = #tpu.pipeline_mode<synchronous>, transform_indices = @transform_2, window_bounds = array<i64: 128, 128>}, {pipeline_mode = #tpu.pipeline_mode<synchronous>, transform_indices = @transform_3, window_bounds = array<i64: 3, 128>}, {transform_indices = @transform_4, window_bounds = array<i64: 16, 128>}]} {
    %c0 = arith.constant 0 : index
    %c0_0 = arith.constant 0 : index
    %0 = vector.load %arg1[%c0, %c0_0] : memref<16x128xf32, #tpu.memory_space<vmem>>, vector<16x128xf32>
    %1 = arith.truncf %0 : vector<16x128xf32> to vector<16x128xbf16>
    %c0_1 = arith.constant 0 : index
    %c0_2 = arith.constant 0 : index
    %2 = vector.load %arg3[%c0_1, %c0_2] : memref<128x128xbf16, #tpu.memory_space<vmem>>, vector<128x128xbf16>
    %cst = arith.constant dense<0.000000e+00> : vector<16x128xf32>
    %3 = tpu.matmul %1, %2, %cst {dimension_numbers = #tpu.dot_dimension_numbers<[1], [0], [0], [1], [0, 0, 1, 1], [], []>} : vector<16x128xbf16>, vector<128x128xbf16>, vector<16x128xf32> -> vector<16x128xf32>
    %c0_3 = arith.constant 0 : index
    %c0_4 = arith.constant 0 : index
    %4 = vector.load %arg4[%c0_3, %c0_4] : memref<3x128xf32, #tpu.memory_space<vmem>>, vector<1x128xf32>
    %5 = vector.broadcast %4 : vector<1x128xf32> to vector<16x128xf32>
    %6 = arith.addf %3, %5 : vector<16x128xf32>
    %c0_5 = arith.constant 0 : index
    %c0_6 = arith.constant 0 : index
    %7 = vector.load %arg2[%c0_5, %c0_6] : memref<16x128xf32, #tpu.memory_space<vmem>>, vector<16x128xf32>
    %8 = arith.addf %6, %7 : vector<16x128xf32>
    %cst_7 = arith.constant dense<0.000000e+00> : vector<16xf32>
    %9 = vector.multi_reduction <add>, %8, %cst_7 [1] : vector<16x128xf32> to vector<16xf32>
    %10 = vector.shape_cast %9 : vector<16xf32> to vector<16x1xf32>
    %cst_8 = arith.constant 1.280000e+02 : f32
    %11 = vector.broadcast %cst_8 : f32 to vector<16x1xf32>
    %12 = arith.divf %10, %11 : vector<16x1xf32>
    %13 = arith.mulf %8, %8 : vector<16x128xf32>
    %cst_9 = arith.constant dense<0.000000e+00> : vector<16xf32>
    %14 = vector.multi_reduction <add>, %13, %cst_9 [1] : vector<16x128xf32> to vector<16xf32>
    %15 = vector.shape_cast %14 : vector<16xf32> to vector<16x1xf32>
    %cst_10 = arith.constant 1.280000e+02 : f32
    %16 = vector.broadcast %cst_10 : f32 to vector<16x1xf32>
    %17 = arith.divf %15, %16 : vector<16x1xf32>
    %18 = arith.mulf %12, %12 : vector<16x1xf32>
    %19 = arith.subf %17, %18 : vector<16x1xf32>
    %cst_11 = arith.constant 0.000000e+00 : f32
    %20 = vector.broadcast %cst_11 : f32 to vector<16x1xf32>
    %21 = arith.maximumf %19, %20 : vector<16x1xf32>
    %cst_12 = arith.constant 9.99999974E-6 : f32
    %22 = vector.broadcast %cst_12 : f32 to vector<16x1xf32>
    %23 = arith.addf %21, %22 : vector<16x1xf32>
    %24 = math.rsqrt %23 : vector<16x1xf32>
    %25 = vector.broadcast %12 : vector<16x1xf32> to vector<16x128xf32>
    %26 = arith.subf %8, %25 : vector<16x128xf32>
    %27 = vector.broadcast %24 : vector<16x1xf32> to vector<16x128xf32>
    %28 = arith.mulf %26, %27 : vector<16x128xf32>
    %c1 = arith.constant 1 : index
    %c0_13 = arith.constant 0 : index
    %29 = vector.load %arg4[%c1, %c0_13] : memref<3x128xf32, #tpu.memory_space<vmem>>, vector<1x128xf32>
    %30 = vector.broadcast %29 : vector<1x128xf32> to vector<16x128xf32>
    %31 = arith.mulf %28, %30 : vector<16x128xf32>
    %c2 = arith.constant 2 : index
    %c0_14 = arith.constant 0 : index
    %32 = vector.load %arg4[%c2, %c0_14] : memref<3x128xf32, #tpu.memory_space<vmem>>, vector<1x128xf32>
    %33 = vector.broadcast %32 : vector<1x128xf32> to vector<16x128xf32>
    %34 = arith.addf %31, %33 : vector<16x128xf32>
    %c0_15 = arith.constant 0 : index
    %c0_16 = arith.constant 0 : index
    %35 = vector.load %arg5[%c0_15, %c0_16] : memref<16x128xf32, #tpu.memory_space<vmem>>, vector<16x128xf32>
    tpu.vector_store %arg5[%c0_15, %c0_16], %34 {strides = array<i32>} : memref<16x128xf32, #tpu.memory_space<vmem>>, vector<16x128xf32>,
    return
  }
  func.func @transform_0(%arg0: i32) -> (i32, i32) {
    %c0_i32 = arith.constant 0 : i32
    %c0_i32_0 = arith.constant 0 : i32
    return %arg0, %c0_i32 : i32, i32
  }
  func.func @transform_1(%arg0: i32) -> (i32, i32) {
    %c0_i32 = arith.constant 0 : i32
    %c0_i32_0 = arith.constant 0 : i32
    return %arg0, %c0_i32 : i32, i32
  }
  func.func @transform_2(%arg0: i32) -> (i32, i32) {
    %c0_i32 = arith.constant 0 : i32
    %c0_i32_0 = arith.constant 0 : i32
    %c0_i32_1 = arith.constant 0 : i32
    return %c0_i32, %c0_i32_0 : i32, i32
  }
  func.func @transform_3(%arg0: i32) -> (i32, i32) {
    %c0_i32 = arith.constant 0 : i32
    %c0_i32_0 = arith.constant 0 : i32
    %c0_i32_1 = arith.constant 0 : i32
    return %c0_i32, %c0_i32_0 : i32, i32
  }
  func.func @transform_4(%arg0: i32) -> (i32, i32) {
    %c0_i32 = arith.constant 0 : i32
    %c0_i32_0 = arith.constant 0 : i32
    return %arg0, %c0_i32 : i32, i32
  }
}

</mosaic_0001>

<bundles_post_ra>
// kernel: tpu_custom_call.1
= control target key start
LH: loop header
LB: loop body
LE: loop exit
PB: predicated region body
PF: predicated region fallthrough
CT: control target
= control target key end

     0   :  { %9 = vsyncpa [#allocation3], 0  ;;  %s504_s0 = inlined_call_operand.hbm [shape: f32[16,128], index: 0, kind: input, shape index: {}]   ;;  %s505_s1 = inlined_call_operand.hbm [shape: f32[16,128], index: 1, kind: input, shape index: {}]   ;;  %s506_s2 = inlined_call_operand.hbm [shape: bf16[128,128], index: 2, kind: input, shape index: {}]   ;;  %s507_s3 = inlined_call_operand.vmem [shape: f32[3,128], index: 3, kind: input, shape index: {}]   ;;  %s508_s4 = inlined_call_operand.hbm [shape: f32[16,128], index: 4, kind: output, shape index: {}]  }
   0x1   :  { %10 = vsyncpa [#allocation6], 0 }
   0x2   :  { %11 = vsyncpa [#allocation4], 0  ;;  %s396_s15 = smov [#allocation5]   ;;  %s397_s17 = smov [#allocation2]  }
   0x3   :  { %s29_s16 = sshll.u32 %s396_s15, 4  ;;  %s17_s18 = sshll.u32 %s397_s17, 4  ;;  %s30_s16 = int_to_ptr.vmem [resolvable:$true] %s29_s16  ;;  %s431_s18 = int_to_ptr.vmem [resolvable:$true] %s17_s18 }
   0x4   :  { %s302_s21 = scalar_lea.hbm %s505_s1, 256 }
   0x5   :  { %p303_p0 = scmp.ne.s32.totalorder %s505_s1, %s302_s21  ;;  %p306_p1 = scmp.lt.u32.totalorder %s302_s21, %s505_s1 }
   0x7   :  { %p308_p2 = pnand %p306_p1, %p303_p0 }
   0x9   :  { %311 = shalt.err (!%p308_p2)
}
   0xa   :  { %s312_s26 = scalar_lea.vmem %s30_s16, 256  ;;  %p317_p4 = scmp.lt.s32.totalorder %s30_s16, %s30_s16 }
   0xb   :  { %p313_p3 = scmp.ne.s32.totalorder %s30_s16, %s312_s26  ;;  %p318_p5 = scmp.lt.s32.totalorder %s312_s26, %s312_s26 }
   0xd   :  { %p319_p6 = por %p318_p5, %p317_p4 }
   0xf   :  { %p320_p7 = pnand %p319_p6, %p313_p3 }
  0x11   :  { %323 = shalt.err (!%p320_p7)
}
  0x12   :  { %s398_s27 = smov 128   ;;  %s399_s28 = smov 8  }
  0x13   :  { %35 = dma.hbm_to_vmem [thread:$0]  %s505_s1, 256, %s30_s16, [#allocation6], %s398_s27, %s398_s27, %s399_s28  }
  0x14   :  { %s324_s7 = scalar_lea.hbm %s504_s0, 256 }
  0x15   :  { %p325_p8 = scmp.ne.s32.totalorder %s504_s0, %s324_s7  ;;  %p328_p9 = scmp.lt.u32.totalorder %s324_s7, %s504_s0 }
  0x17   :  { %p330_p10 = pnand %p328_p9, %p325_p8 }
  0x19   :  { %333 = shalt.err (!%p330_p10)
}
  0x1a   :  { %s334_s12 = scalar_lea.vmem %s431_s18, 256  ;;  %p339_p12 = scmp.lt.s32.totalorder %s431_s18, %s431_s18 }
  0x1b   :  { %p335_p11 = scmp.ne.s32.totalorder %s431_s18, %s334_s12  ;;  %p340_p13 = scmp.lt.s32.totalorder %s334_s12, %s334_s12 }
  0x1d   :  { %p341_p0 = por %p340_p13, %p339_p12 }
  0x1f   :  { %p342_p1 = pnand %p341_p0, %p335_p11 }
  0x21   :  { %345 = shalt.err (!%p342_p1)
}
  0x22   :  { %23 = dma.hbm_to_vmem [thread:$0]  %s504_s0, 256, %s431_s18, [#allocation3], %s398_s27, %s398_s27, %s399_s28  }
  0x23   :  { %s400_s14 = smov [#allocation7]   ;;  %s346_s19 = scalar_lea.hbm %s506_s2, 1024 }
  0x24   :  { %s41_s15 = sshll.u32 %s400_s14, 4  ;;  %p347_p2 = scmp.ne.s32.totalorder %s506_s2, %s346_s19  ;;  %s42_s15 = int_to_ptr.vmem [resolvable:$true] %s41_s15 }
  0x25   :  { %p350_p3 = scmp.lt.u32.totalorder %s346_s19, %s506_s2 }
  0x27   :  { %p352_p4 = pnand %p350_p3, %p347_p2 }
  0x29   :  { %355 = shalt.err (!%p352_p4)
}
  0x2a   :  { %s356_s24 = scalar_lea.vmem %s42_s15, 1024  ;;  %p361_p6 = scmp.lt.s32.totalorder %s42_s15, %s42_s15 }
  0x2b   :  { %p357_p5 = scmp.ne.s32.totalorder %s42_s15, %s356_s24  ;;  %p362_p7 = scmp.lt.s32.totalorder %s356_s24, %s356_s24 }
  0x2d   :  { %p363_p8 = por %p362_p7, %p361_p6 }
  0x2f   :  { %p364_p9 = pnand %p363_p8, %p357_p5 }
  0x31   :  { %367 = shalt.err (!%p364_p9)
}
  0x32   :  { %s401_s0 = smov 64   ;;  %s402_s18 = smov 4  }
  0x33   :  { %47 = dma.hbm_to_vmem [thread:$0]  %s506_s2, 1024, %s42_s15, [#allocation6], %s401_s0, %s401_s0, %s402_s18  }
  0x34   :  { %390 = dma.done.wait [#allocation3], 256  }
  0x35   :  { %391 = vsyncadd [#allocation3], 4294967040 }
  0x36   :  { %392 = dma.done.wait [#allocation6], 1280  }
  0x37   :  { %393 = vsyncadd [#allocation6], 4294966016  ;;  %v403_v0 = vmov 0.0   ;;  %vm404_vm0 = vmmov 0   ;;  %v290_v1 = vld [vmem:[#allocation7] sm:$0xff]   ;;  %v291_v2 = vld [vmem:[#allocation7 + $0x8] sm:$0xff]  }
  0x38   :  { %260 = vmatprep.subr.bf16.mxu0 %v403_v0  ;;  %276 = vmatprep.mubr.msk.bf16.mxu0 %vm404_vm0, %v403_v0  ;;  %v292_v3 = vld [vmem:[#allocation7 + $0x10] sm:$0xff]   ;;  %v293_v4 = vld [vmem:[#allocation7 + $0x18] sm:$0xff]   ;;  %v294_v5 = vld [vmem:[#allocation7 + $0x20] sm:$0xff]   ;;  %s405_s8 = smov [#allocation8]  }
  0x39   :  { %261 = vmatpush3.bf16.msra.mxu0 %v290_v1  ;;  %v295_v6 = vld [vmem:[#allocation7 + $0x28] sm:$0xff]   ;;  %v296_v7 = vld [vmem:[#allocation7 + $0x30] sm:$0xff]   ;;  %v297_v8 = vld [vmem:[#allocation7 + $0x38] sm:$0xff]   ;;  %s227_s9 = sshll.u32 %s405_s8, 4  ;;  %s228_s9 = int_to_ptr.vmem [resolvable:$true] %s227_s9 }
  0x3a   :  { %262 = vmatprep.subr.bf16.mxu0 %v403_v0  ;;  %v60_v9 = vld [vmem:[#allocation2] sm:$0xff]  ;;  %v61_v10 = vld [vmem:[#allocation2 + $0x8] sm:$0xff]  ;;  %v173_v14 = vld [vmem:[#allocation5] sm:$0xff]  ;;  %s368_s10 = scalar_lea.vmem %s228_s9, 256  ;;  %p373_p11 = scmp.lt.s32.totalorder %s228_s9, %s228_s9 }
  0x3b   :  { %v62_v11 = vpack.c.bf16 %v61_v10, %v60_v9  ;;  %v240_v12 = vld [vmem:[%s507_s3] ss:$0 sm:$0xff]  ;;  %v174_v18 = vld [vmem:[#allocation5 + $0x8] sm:$0xff]  ;;  %v249_v43 = vld [vmem:[%s507_s3 + $0x1] ss:$0 sm:$0xff]  ;;  %p369_p10 = scmp.ne.s32.totalorder %s228_s9, %s368_s10  ;;  %p374_p12 = scmp.lt.s32.totalorder %s368_s10, %s368_s10 }
  0x3c   :  { %v250_v45 = vld [vmem:[%s507_s3 + $0x2] ss:$0 sm:$0xff] }
  0x3d   :  { %263 = vmatpush3.bf16.msra.mxu0 %v291_v2  ;;  %p375_p13 = por %p374_p12, %p373_p11 }
  0x3e   :  { %264 = vmatprep.subr.bf16.mxu0 %v403_v0 }
  0x3f   :  { %p376_p0 = pnand %p375_p13, %p369_p10 }
  0x41   :  { %265 = vmatpush3.bf16.msra.mxu0 %v292_v3 }
  0x42   :  { %266 = vmatprep.subr.bf16.mxu0 %v403_v0 }
  0x45   :  { %267 = vmatpush3.bf16.msra.mxu0 %v293_v4 }
  0x46   :  { %268 = vmatprep.subr.bf16.mxu0 %v403_v0 }
  0x49   :  { %269 = vmatpush3.bf16.msra.mxu0 %v294_v5 }
  0x4a   :  { %270 = vmatprep.subr.bf16.mxu0 %v403_v0 }
  0x4d   :  { %271 = vmatpush3.bf16.msra.mxu0 %v295_v6 }
  0x4e   :  { %272 = vmatprep.subr.bf16.mxu0 %v403_v0 }
  0x51   :  { %273 = vmatpush3.bf16.msra.mxu0 %v296_v7 }
  0x52   :  { %274 = vmatprep.subr.bf16.mxu0 %v403_v0 }
  0x55   :  { %275 = vmatpush3.bf16.msra.mxu0 %v297_v8 }
  0x58   :  { %277 = vmatmul.mubr.bf16.vlgmr.msra.gmra.mrb[0].mxu0 %v62_v11 }
 0x12b   :  { %v166_v13 = vpop.f32.mrb[0].mxu0 }
 0x12c   :  { %v167_v15 = vadd.f32 %v240_v12, %v166_v13  ;;  %v278_v16 = vpop.f32.mrb[1].mxu0 }
 0x12d   :  { %v169_v17 = vpop.f32.mrb[2].mxu0 }
 0x12e   :  { %v175_v19 = vadd.f32 %v173_v14, %v167_v15  ;;  %v170_v20 = vadd.f32 %v240_v12, %v169_v17  ;;  %v279_v21 = vpop.f32.mrb[3].mxu0 }
 0x130   :  { %v176_v22 = vadd.f32 %v174_v18, %v170_v20  ;;  %177 = vadd.xlane.f32.xlu0 %v175_v19  ;;  %v184_v23 = vmul.f32 %v175_v19, %v175_v19 }
 0x132   :  { %186 = vadd.xlane.f32.xlu1 %v184_v23  ;;  %v185_v24 = vmul.f32 %v176_v22, %v176_v22 }
 0x134   :  { %179 = vadd.xlane.f32.xlu0 %v176_v22 }
 0x136   :  { %188 = vadd.xlane.f32.xlu1 %v185_v24 }
 0x1bd   :  { %v178_v25 = vpop.xlane.xlu0 %177 }
 0x1be   :  { %v182_v26 = vmul.f32 0.0078125, %v178_v25 }
 0x1bf   :  { %v187_v27 = vpop.xlane.xlu1 %186 }
 0x1c0   :  { %v192_v28 = vmul.f32 %v182_v26, %v182_v26  ;;  %v190_v29 = vmul.f32 0.0078125, %v187_v27  ;;  %v202_v41 = vsub.f32 %v175_v19, %v182_v26 }
 0x1c1   :  { %v180_v30 = vpop.xlane.xlu0 %179 }
 0x1c2   :  { %v194_v31 = vsub.f32 %v190_v29, %v192_v28  ;;  %v183_v32 = vmul.f32 0.0078125, %v180_v30 }
 0x1c3   :  { %v189_v33 = vpop.xlane.xlu1 %188 }
 0x1c4   :  { %v196_v34 = vmax.f32 %v194_v31, 0.0  ;;  %v193_v35 = vmul.f32 %v183_v32, %v183_v32  ;;  %v191_v36 = vmul.f32 0.0078125, %v189_v33  ;;  %v203_v46 = vsub.f32 %v176_v22, %v183_v32 }
 0x1c6   :  { %v198_v37 = vadd.f32 1e-05, %v196_v34  ;;  %v195_v38 = vsub.f32 %v191_v36, %v193_v35 }
 0x1c8   :  { %298 = vrsqrt.f32 %v198_v37  ;;  %v197_v39 = vmax.f32 %v195_v38, 0.0 }
 0x1ca   :  { %v199_v40 = vadd.f32 1e-05, %v197_v39 }
 0x1cc   :  { %300 = vrsqrt.f32 %v199_v40 }
 0x1d2   :  { %v299_v42 = vpop.eup %298 }
 0x1d3   :  { %v204_v44 = vmul.f32 %v299_v42, %v202_v41 }
 0x1d5   :  { %v211_v47 = vmul.f32 %v249_v43, %v204_v44 }
 0x1d6   :  { %v301_v48 = vpop.eup %300 }
 0x1d7   :  { %v205_v49 = vmul.f32 %v301_v48, %v203_v46  ;;  %v218_v50 = vadd.f32 %v250_v45, %v211_v47 }
 0x1d9   :  { %v212_v51 = vmul.f32 %v249_v43, %v205_v49  ;;  %220 = vst [vmem:[#allocation8] sm:$0xff] %v218_v50 }
 0x1db   :  { %v219_v52 = vadd.f32 %v250_v45, %v212_v51 }
 0x1dd   :  { %221 = vst [vmem:[#allocation8 + $0x8] sm:$0xff] %v219_v52 }
 0x1de   :  { %379 = shalt.err (!%p376_p0)
}
 0x1df   :  { %s380_s12 = scalar_lea.hbm %s508_s4, 256 }
 0x1e0   :  { %p381_p1 = scmp.ne.s32.totalorder %s508_s4, %s380_s12  ;;  %p384_p2 = scmp.lt.u32.totalorder %s380_s12, %s508_s4 }
 0x1e2   :  { %p386_p3 = pnand %p384_p2, %p381_p1 }
 0x1e4   :  { %389 = shalt.err (!%p386_p3)
}
 0x1e5   :  { %233 = dma.vmem_to_hbm [thread:$0]  %s228_s9, 256, %s508_s4, [#allocation4], %s398_s27, %s398_s27, %s399_s28  }
 0x1e6   :  { %394 = dma.done.wait [#allocation4], 256  }
 0x1e7   :  { %395 = vsyncadd [#allocation4], 4294967040 }
 0x1e8   :  { %237 = vsyncpa [#allocation3], 1 }
 0x1e9   :  { %238 = vsyncpa [#allocation6], 1 }
 0x1ea   :  { %239 = vsyncpa [#allocation4], 1 }

</bundles_post_ra>
